<compile_context>
chip_gen: v6e
topology: v6e:2x2x1
jax: 0.10.0
libtpu: 0.0.40
codegen_flags: <defaults>
</compile_context>

<pallas_src>
import jax
import jax.numpy as jnp
from jax import lax
from jax.experimental import pallas as pl
from jax.experimental.pallas import tpu as pltpu

LSPAN = 4
RSPAN = 4
SEQ_LEN = LSPAN + RSPAN          # 8
HIDDEN = (512, 128, 32, 1)       # layer widths from the nn.Sequential
LEAKY_SLOPE = 0.01               # PyTorch nn.LeakyReLU default
MAX_TB = 2048                    # batch tile (rows / grid step); multiple of 16


def _device_kind():
    try:
        return jax.devices()[0].device_kind.lower()
    except Exception:  # pragma: no cover - defensive, assume modern TPU
        return ""


_KIND = _device_kind()
# v5e and older have no bf16 VALU path -> keep the elementwise epilogue in f32 there.
_BF16_EPILOGUE = not any(t in _KIND for t in ("v2", "v3", "v4", "v5"))
# 128-MiB-VMEM generations can take a raised scoped-VMEM limit; leave the default on v7x.
_VMEM_LIMIT = 64 << 20 if any(t in _KIND for t in ("v4", "v5", "v6")) else None
# v7x has 2 TensorCores per chip: make sure the "parallel" batch grid has >= 2 tiles.
_CORE_SPLIT = 2 if "v7" in _KIND else 1


def _round_up(n, m):
    return ((n + m - 1) // m) * m


def _epilogue(h_f32):
    """LeakyReLU via max (2 VPU ops); bf16-packed on chips with bf16 VALUs."""
    if _BF16_EPILOGUE:
        h = h_f32.astype(jnp.bfloat16)
        return jnp.maximum(h, LEAKY_SLOPE * h)
    h = jnp.maximum(h_f32, LEAKY_SLOPE * h_f32)
    return h.astype(jnp.bfloat16)


def fcdisc_kernel(x_ref,
                  w1_ref,
                  w2_ref, b2_ref,
                  w3_ref, b3_ref,
                  w4_ref, b4_ref,
                  o_ref):
    # x_ref: (TB, 9) bf16 tile (last column is ones -> folds the layer-1 bias).
    # Weights are VMEM-resident full blocks (bf16); biases f32 rows.
    x = x_ref[...]

    # Layer 1: (TB,9)@(9,512) on the MXU, bias folded into w1's 9th row.
    h = jnp.dot(x, w1_ref[...], preferred_element_type=jnp.float32)
    h = _epilogue(h)

    # Layer 2: (TB,512)@(512,128).
    h = jnp.dot(h, w2_ref[...], preferred_element_type=jnp.float32) + b2_ref[...]
    h = _epilogue(h)

    # Layer 3: (TB,128)@(128,32).
    h = jnp.dot(h, w3_ref[...], preferred_element_type=jnp.float32) + b3_ref[...]
    h = _epilogue(h)                                   # bf16 (TB, 32)

    # Head: lane-dense.  w4_ref is (8,32) bf16 (row replicated); contract last-last
    # (flash-attention dimension numbers) -> (8, TB) f32 with batch on the lanes.
    s = lax.dot_general(w4_ref[...], h, (((1,), (1,)), ((), ())),
                        preferred_element_type=jnp.float32)
    logits = s[0:1, :] + b4_ref[...]                   # (1, TB)

    # Sigmoid: exp and reciprocal both on the (otherwise idle) EUP slot.
    o_ref[0] = pl.reciprocal(1.0 + jnp.exp(-logits), approx=True)


def init_params(key):
    """Deterministic parameter init matching PyTorch Linear shapes (out, in)."""
    dims = (SEQ_LEN,) + HIDDEN
    params = []
    for i in range(4):
        fan_in, fan_out = dims[i], dims[i + 1]
        key, kw, kb = jax.random.split(key, 3)
        bound = 1.0 / (fan_in ** 0.5)
        w = jax.random.uniform(kw, (fan_out, fan_in), jnp.float32, -bound, bound)
        b = jax.random.uniform(kb, (fan_out,), jnp.float32, -bound, bound)
        params.append((w, b))
    return params


def prepare_params(params):
    """One-time (outside the hot path) transpose / cast / fold of PyTorch-layout params.

    Layer 1: weight (9, 512) bf16 with b1 as the last row (bias folded into the MXU).
    Layers 2-3: weight (in, out) bf16, bias (1, out) f32.
    Layer 4: weight as an (8, 32) bf16 replicated row (MXU lhs), bias (1, 1) f32.
    """
    (w1, b1), (w2, b2), (w3, b3), (w4, b4) = params
    w1_aug = jnp.concatenate([w1.T, b1.reshape(1, -1)], axis=0).astype(jnp.bfloat16)
    w4_rep = jnp.tile(w4.reshape(1, -1), (8, 1)).astype(jnp.bfloat16)
    return (
        w1_aug,
        w2.T.astype(jnp.bfloat16), b2.reshape(1, -1).astype(jnp.float32),
        w3.T.astype(jnp.bfloat16), b3.reshape(1, -1).astype(jnp.float32),
        w4_rep, b4.reshape(1, 1).astype(jnp.float32),
    )


def _choose_tb(batch):
    tb = min(MAX_TB, _round_up(batch, 16))
    if _CORE_SPLIT > 1 and batch > 16 * _CORE_SPLIT:
        # v7x: guarantee num_tiles >= 2 so the "parallel" grid feeds both TensorCores.
        tb = min(tb, _round_up(-(-batch // _CORE_SPLIT), 16))
    return tb


@jax.jit
def fcdiscriminator_forward(x, prepared):
    # x.view(-1, seq_len); append a ones column (folds the layer-1 bias); cast to bf16.
    x2d = x.reshape(-1, SEQ_LEN).astype(jnp.float32)
    batch = x2d.shape[0]
    x_aug = jnp.concatenate(
        [x2d, jnp.ones((batch, 1), jnp.float32)], axis=1).astype(jnp.bfloat16)

    tb = _choose_tb(batch)
    num_tiles = pl.cdiv(batch, tb)
    padded = num_tiles * tb
    if padded != batch:
        x_aug = jnp.pad(x_aug, ((0, padded - batch), (0, 0)))

    w1, w2, b2, w3, b3, w4, b4 = prepared

    def const_spec(a):            # weights/biases: same full block every grid step
        return pl.BlockSpec(a.shape, lambda i, _nd=a.ndim: (0,) * _nd)

    out = pl.pallas_call(
        fcdisc_kernel,
        out_shape=jax.ShapeDtypeStruct((num_tiles, 1, tb), jnp.float32),
        grid=(num_tiles,),
        in_specs=[
            pl.BlockSpec((tb, SEQ_LEN + 1), lambda i: (i, 0)),   # x tile, pipelined
            const_spec(w1),
            const_spec(w2), const_spec(b2),
            const_spec(w3), const_spec(b3),
            const_spec(w4), const_spec(b4),
        ],
        out_specs=pl.BlockSpec((1, 1, tb), lambda i: (i, 0, 0)),  # lane-dense output row
        compiler_params=pltpu.CompilerParams(
            dimension_semantics=("parallel",),                    # 2x on v7x megacore
            vmem_limit_bytes=_VMEM_LIMIT),
    )(x_aug, w1, w2, b2, w3, b3, w4, b4)

    return out.reshape(padded, 1)[:batch]


def reference_forward(x, params):
    """Pure-JAX f32 reference of the PyTorch module (eval mode)."""
    h = x.reshape(-1, SEQ_LEN).astype(jnp.float32)
    for i, (w, b) in enumerate(params):
        h = h @ w.T + b
        if i < 3:
            h = jnp.where(h > 0, h, LEAKY_SLOPE * h)
        else:
            h = jax.nn.sigmoid(h)
    return h


if __name__ == "__main__":
    key = jax.random.PRNGKey(0)
    kx, kp = jax.random.split(key)

    batch = 2
    x = jax.random.normal(kx, (batch, SEQ_LEN), dtype=jnp.float32)
    params = init_params(kp)
    prepared = prepare_params(params)          # one-time transpose / cast / bias-fold

    out = fcdiscriminator_forward(x, prepared)
    out = jax.block_until_ready(out)

    ref = reference_forward(x, params)
    assert out.shape == (batch, 1)
    # bf16 matmuls / bf16-folded bias / approx reciprocal -> loosened tolerance vs f32 ref.
    assert jnp.allclose(out, ref, atol=3e-2, rtol=3e-2), (out, ref)

    print("KERNEL_OK")
</pallas_src>

<mosaic_0001>
module attributes {stable_mosaic.version = 11 : i64} {
  func.func @fcdisc_kernel(%arg0: i32, %arg1: memref<16x9xbf16, #tpu.memory_space<vmem>>, %arg2: memref<9x512xbf16, #tpu.memory_space<vmem>>, %arg3: memref<512x128xbf16, #tpu.memory_space<vmem>>, %arg4: memref<1x128xf32, #tpu.memory_space<vmem>>, %arg5: memref<128x32xbf16, #tpu.memory_space<vmem>>, %arg6: memref<1x32xf32, #tpu.memory_space<vmem>>, %arg7: memref<8x32xbf16, #tpu.memory_space<vmem>>, %arg8: memref<1x1xf32, #tpu.memory_space<vmem>>, %arg9: memref<1x1x16xf32, #tpu.memory_space<vmem>>) attributes {dimension_semantics = [#tpu.dimension_semantics<parallel>], iteration_bounds = array<i64: 1>, scalar_prefetch = 0 : i64, scratch_operands = 0 : i64, tpu.core_type = #tpu.core_type<tc>, window_params = [{transform_indices = @transform_0, window_bounds = array<i64: 16, 9>}, {pipeline_mode = #tpu.pipeline_mode<synchronous>, transform_indices = @transform_1, window_bounds = array<i64: 9, 512>}, {pipeline_mode = #tpu.pipeline_mode<synchronous>, transform_indices = @transform_2, window_bounds = array<i64: 512, 128>}, {pipeline_mode = #tpu.pipeline_mode<synchronous>, transform_indices = @transform_3, window_bounds = array<i64: 1, 128>}, {pipeline_mode = #tpu.pipeline_mode<synchronous>, transform_indices = @transform_4, window_bounds = array<i64: 128, 32>}, {pipeline_mode = #tpu.pipeline_mode<synchronous>, transform_indices = @transform_5, window_bounds = array<i64: 1, 32>}, {pipeline_mode = #tpu.pipeline_mode<synchronous>, transform_indices = @transform_6, window_bounds = array<i64: 8, 32>}, {pipeline_mode = #tpu.pipeline_mode<synchronous>, transform_indices = @transform_7, window_bounds = array<i64: 1, 1>}, {transform_indices = @transform_8, window_bounds = array<i64: 1, 1, 16>}]} {
    %c0 = arith.constant 0 : index
    %c0_0 = arith.constant 0 : index
    %0 = vector.load %arg1[%c0, %c0_0] : memref<16x9xbf16, #tpu.memory_space<vmem>>, vector<16x9xbf16>
    %c0_1 = arith.constant 0 : index
    %c0_2 = arith.constant 0 : index
    %1 = vector.load %arg2[%c0_1, %c0_2] : memref<9x512xbf16, #tpu.memory_space<vmem>>, vector<9x512xbf16>
    %cst = arith.constant dense<0.000000e+00> : vector<16x512xf32>
    %2 = tpu.matmul %0, %1, %cst {dimension_numbers = #tpu.dot_dimension_numbers<[1], [0], [0], [1], [0, 0, 1, 1], [], []>} : vector<16x9xbf16>, vector<9x512xbf16>, vector<16x512xf32> -> vector<16x512xf32>
    %3 = arith.truncf %2 : vector<16x512xf32> to vector<16x512xbf16>
    %cst_3 = arith.constant 1.000980e-02 : bf16
    %4 = vector.broadcast %cst_3 : bf16 to vector<16x512xbf16>
    %5 = arith.mulf %4, %3 : vector<16x512xbf16>
    %6 = arith.maximumf %3, %5 : vector<16x512xbf16>
    %c0_4 = arith.constant 0 : index
    %c0_5 = arith.constant 0 : index
    %7 = vector.load %arg3[%c0_4, %c0_5] : memref<512x128xbf16, #tpu.memory_space<vmem>>, vector<512x128xbf16>
    %cst_6 = arith.constant dense<0.000000e+00> : vector<16x128xf32>
    %8 = tpu.matmul %6, %7, %cst_6 {dimension_numbers = #tpu.dot_dimension_numbers<[1], [0], [0], [1], [0, 0, 1, 1], [], []>} : vector<16x512xbf16>, vector<512x128xbf16>, vector<16x128xf32> -> vector<16x128xf32>
    %c0_7 = arith.constant 0 : index
    %c0_8 = arith.constant 0 : index
    %9 = vector.load %arg4[%c0_7, %c0_8] : memref<1x128xf32, #tpu.memory_space<vmem>>, vector<1x128xf32>
    %10 = vector.broadcast %9 : vector<1x128xf32> to vector<16x128xf32>
    %11 = arith.addf %8, %10 : vector<16x128xf32>
    %12 = arith.truncf %11 : vector<16x128xf32> to vector<16x128xbf16>
    %cst_9 = arith.constant 1.000980e-02 : bf16
    %13 = vector.broadcast %cst_9 : bf16 to vector<16x128xbf16>
    %14 = arith.mulf %13, %12 : vector<16x128xbf16>
    %15 = arith.maximumf %12, %14 : vector<16x128xbf16>
    %c0_10 = arith.constant 0 : index
    %c0_11 = arith.constant 0 : index
    %16 = vector.load %arg5[%c0_10, %c0_11] : memref<128x32xbf16, #tpu.memory_space<vmem>>, vector<128x32xbf16>
    %cst_12 = arith.constant dense<0.000000e+00> : vector<16x32xf32>
    %17 = tpu.matmul %15, %16, %cst_12 {dimension_numbers = #tpu.dot_dimension_numbers<[1], [0], [0], [1], [0, 0, 1, 1], [], []>} : vector<16x128xbf16>, vector<128x32xbf16>, vector<16x32xf32> -> vector<16x32xf32>
    %c0_13 = arith.constant 0 : index
    %c0_14 = arith.constant 0 : index
    %18 = vector.load %arg6[%c0_13, %c0_14] : memref<1x32xf32, #tpu.memory_space<vmem>>, vector<1x32xf32>
    %19 = vector.broadcast %18 : vector<1x32xf32> to vector<16x32xf32>
    %20 = arith.addf %17, %19 : vector<16x32xf32>
    %21 = arith.truncf %20 : vector<16x32xf32> to vector<16x32xbf16>
    %cst_15 = arith.constant 1.000980e-02 : bf16
    %22 = vector.broadcast %cst_15 : bf16 to vector<16x32xbf16>
    %23 = arith.mulf %22, %21 : vector<16x32xbf16>
    %24 = arith.maximumf %21, %23 : vector<16x32xbf16>
    %c0_16 = arith.constant 0 : index
    %c0_17 = arith.constant 0 : index
    %25 = vector.load %arg7[%c0_16, %c0_17] : memref<8x32xbf16, #tpu.memory_space<vmem>>, vector<8x32xbf16>
    %cst_18 = arith.constant dense<0.000000e+00> : vector<8x16xf32>
    %26 = tpu.matmul %25, %24, %cst_18 {dimension_numbers = #tpu.dot_dimension_numbers<[1], [1], [0], [0], [0, 0, 1, 0], [], []>} : vector<8x32xbf16>, vector<16x32xbf16>, vector<8x16xf32> -> vector<8x16xf32>
    %27 = vector.extract_strided_slice %26 {offsets = [0, 0], sizes = [1, 16], strides = [1, 1]} : vector<8x16xf32> to vector<1x16xf32>
    %c0_19 = arith.constant 0 : index
    %c0_20 = arith.constant 0 : index
    %28 = vector.load %arg8[%c0_19, %c0_20] : memref<1x1xf32, #tpu.memory_space<vmem>>, vector<1x1xf32>
    %29 = vector.broadcast %28 : vector<1x1xf32> to vector<1x16xf32>
    %30 = arith.addf %27, %29 : vector<1x16xf32>
    %cst_21 = arith.constant 0.000000e+00 : f32
    %31 = vector.broadcast %cst_21 : f32 to vector<1x16xf32>
    %32 = arith.subf %31, %30 : vector<1x16xf32>
    %33 = math.exp %32 : vector<1x16xf32>
    %cst_22 = arith.constant 1.000000e+00 : f32
    %34 = vector.broadcast %cst_22 : f32 to vector<1x16xf32>
    %35 = arith.addf %34, %33 : vector<1x16xf32>
    %36 = tpu.reciprocal %35 {approx = true} : vector<1x16xf32> -> vector<1x16xf32>
    %c0_23 = arith.constant 0 : index
    %c0_24 = arith.constant 0 : index
    %c0_25 = arith.constant 0 : index
    %37 = vector.load %arg9[%c0_23, %c0_24, %c0_25] : memref<1x1x16xf32, #tpu.memory_space<vmem>>, vector<1x1x16xf32>
    %38 = vector.shape_cast %37 : vector<1x1x16xf32> to vector<1x16xf32>
    %39 = vector.shape_cast %36 : vector<1x16xf32> to vector<1x1x16xf32>
    tpu.vector_store %arg9[%c0_23, %c0_24, %c0_25], %39 {strides = array<i32>} : memref<1x1x16xf32, #tpu.memory_space<vmem>>, vector<1x1x16xf32>,
    return
  }
  func.func @transform_0(%arg0: i32) -> (i32, i32) {
    %c0_i32 = arith.constant 0 : i32
    %c0_i32_0 = arith.constant 0 : i32
    return %arg0, %c0_i32 : i32, i32
  }
  func.func @transform_1(%arg0: i32) -> (i32, i32) {
    %c0_i32 = arith.constant 0 : i32
    %c0_i32_0 = arith.constant 0 : i32
    %c0_i32_1 = arith.constant 0 : i32
    return %c0_i32, %c0_i32_0 : i32, i32
  }
  func.func @transform_2(%arg0: i32) -> (i32, i32) {
    %c0_i32 = arith.constant 0 : i32
    %c0_i32_0 = arith.constant 0 : i32
    %c0_i32_1 = arith.constant 0 : i32
    return %c0_i32, %c0_i32_0 : i32, i32
  }
  func.func @transform_3(%arg0: i32) -> (i32, i32) {
    %c0_i32 = arith.constant 0 : i32
    %c0_i32_0 = arith.constant 0 : i32
    %c0_i32_1 = arith.constant 0 : i32
    return %c0_i32, %c0_i32_0 : i32, i32
  }
  func.func @transform_4(%arg0: i32) -> (i32, i32) {
    %c0_i32 = arith.constant 0 : i32
    %c0_i32_0 = arith.constant 0 : i32
    %c0_i32_1 = arith.constant 0 : i32
    return %c0_i32, %c0_i32_0 : i32, i32
  }
  func.func @transform_5(%arg0: i32) -> (i32, i32) {
    %c0_i32 = arith.constant 0 : i32
    %c0_i32_0 = arith.constant 0 : i32
    %c0_i32_1 = arith.constant 0 : i32
    return %c0_i32, %c0_i32_0 : i32, i32
  }
  func.func @transform_6(%arg0: i32) -> (i32, i32) {
    %c0_i32 = arith.constant 0 : i32
    %c0_i32_0 = arith.constant 0 : i32
    %c0_i32_1 = arith.constant 0 : i32
    return %c0_i32, %c0_i32_0 : i32, i32
  }
  func.func @transform_7(%arg0: i32) -> (i32, i32) {
    %c0_i32 = arith.constant 0 : i32
    %c0_i32_0 = arith.constant 0 : i32
    %c0_i32_1 = arith.constant 0 : i32
    return %c0_i32, %c0_i32_0 : i32, i32
  }
  func.func @transform_8(%arg0: i32) -> (i32, i32, i32) {
    %c0_i32 = arith.constant 0 : i32
    %c0_i32_0 = arith.constant 0 : i32
    %c0_i32_1 = arith.constant 0 : i32
    return %arg0, %c0_i32, %c0_i32_0 : i32, i32, i32
  }
}

</mosaic_0001>

<bundles_post_ra>
// kernel: fcdiscriminator_forward.1
= control target key start
LH: loop header
LB: loop body
LE: loop exit
PB: predicated region body
PF: predicated region fallthrough
CT: control target
= control target key end

     0   :  { %s1049_s0 = inlined_call_operand.vmem [shape: bf16[16,9], index: 0, kind: input, shape index: {}]   ;;  %s1050_s1 = inlined_call_operand.vmem [shape: bf16[9,512], index: 1, kind: input, shape index: {}]   ;;  %s1051_s2 = inlined_call_operand.hbm [shape: bf16[512,128], index: 2, kind: input, shape index: {}]   ;;  %s1052_s3 = inlined_call_operand.vmem [shape: f32[1,128], index: 3, kind: input, shape index: {}]   ;;  %s1053_s4 = inlined_call_operand.vmem [shape: bf16[128,32], index: 4, kind: input, shape index: {}]   ;;  %s1054_s5 = inlined_call_operand.vmem [shape: f32[1,32], index: 5, kind: input, shape index: {}]   ;;  %s1055_s6 = inlined_call_operand.vmem [shape: bf16[8,32], index: 6, kind: input, shape index: {}]   ;;  %s1056_s7 = inlined_call_operand.<no memory space> [shape: f32[1,1], index: 7, kind: input, shape index: {}]   ;;  %s1057_s8 = inlined_call_operand.vmem [shape: f32[1,1,16], index: 8, kind: output, shape index: {}]  }
   0x1   :  { %v13_v0 = vstv %s1056_s7 }
   0x2   :  { %14 = vst [vmem:[#allocation2] sm:$0x1] %v13_v0 }
   0x3   :  { %15 = vsyncpa [#allocation4], 0  ;;  %s938_s29 = smov [#allocation3]  }
   0x4   :  { %s25_s30 = sshll.u32 %s938_s29, 4  ;;  %s26_s30 = int_to_ptr.vmem [resolvable:$true] %s25_s30 }
   0x5   :  { %s924_s9 = scalar_lea.vmem %s26_s30, 4096  ;;  %p929_p1 = scmp.lt.s32.totalorder %s26_s30, %s26_s30 }
   0x6   :  { %p925_p0 = scmp.ne.s32.totalorder %s26_s30, %s924_s9  ;;  %p930_p2 = scmp.lt.s32.totalorder %s924_s9, %s924_s9 }
   0x8   :  { %p931_p3 = por %p930_p2, %p929_p1 }
   0xa   :  { %p932_p4 = pnand %p931_p3, %p925_p0 }
   0xc   :  { %935 = shalt.err (!%p932_p4)
}
   0xd   :  { %s939_s10 = smov 64   ;;  %s940_s11 = smov 4  }
   0xe   :  { %31 = dma.hbm_to_vmem [thread:$0]  %s1051_s2, 4096, %s26_s30, [#allocation4], %s939_s10, %s939_s10, %s940_s11  }
   0xf   :  { %936 = dma.done.wait [#allocation4], 4096  }
  0x10   :  { %937 = vsyncadd [#allocation4], 4294963200  ;;  %vm78_vm0 = vcmask 1043456   ;;  %v941_v1 = vmov 0   ;;  %vm79_vm1 = vcmask 1044480   ;;  %v942_v2 = vmov 65535  }
  0x11   :  { %126 = vmatprep.mubr.bf16.mxu1 %v941_v1  ;;  %864 = vset.pattern.permute.xlu0 %v941_v1  ;;  %v80_v3 = vsel %vm78_vm0, 4294967295, %v942_v2  ;;  %v865_v5 = vld [vmem:[%s1050_s1 + $0x4] ss:$16 sps:$4 sm:$0x1f]   ;;  %v872_v12 = vld [vmem:[#allocation3 + $0x78] sm:$0xff]   ;;  %vm74_vm2 = vcmask 72704  }
  0x12   :  { %v81_v4 = vsel %vm79_vm1, %v80_v3, 0  ;;  %v867_v6 = vld [vmem:[%s1050_s1] ss:$16 sps:$4 sm:$0x1f]   ;;  %776 = vmatprep.subr.bf16.mxu0 %v872_v12  ;;  %v874_v16 = vld [vmem:[#allocation3 + $0x70] sm:$0xff]   ;;  %v943_v46 = vmov 0.0  }
  0x13   :  { %v86_v7 = vand.u32 %v865_v5, %v81_v4  ;;  %v868_v8 = vld [vmem:[%s1049_s0] sm:$0xff]   ;;  %v83_v9 = vand.u32 %v867_v6, %v81_v4  ;;  %v869_v10 = vld [vmem:[%s1050_s1 + $0x8] ss:$16 sps:$4 sm:$0x1f]   ;;  %v905_v0 = vld [vmem:[%s1053_s4 + $0x30] sm:$0xff]   ;;  %vm944_vm3 = vmmov 0  }
  0x14   :  { %v871_v11 = vld [vmem:[%s1050_s1 + $0xc] ss:$16 sps:$4 sm:$0x1f]   ;;  %v89_v14 = vand.u32 %v869_v10, %v81_v4  ;;  %v875_v17 = vld [vmem:[#allocation3 + $0x30] sm:$0xff]   ;;  %v880_v22 = vld [vmem:[#allocation3 + $0x60] sm:$0xff]   ;;  %vm656_vm4 = vcmask 261120  }
  0x15   :  { %108 = vmatprep.subr.bf16.mxu1 %v86_v7  ;;  %v92_v13 = vand.u32 %v871_v11, %v81_v4  ;;  %v873_v15 = vld [vmem:[#allocation3 + $0x38] sm:$0xff]   ;;  %v876_v18 = vld [vmem:[#allocation3 + $0x68] sm:$0xff]   ;;  %v881_v23 = vld [vmem:[#allocation3 + $0xf0] sm:$0xff]   ;;  %vm719_vm5 = vcmask 122880  }
  0x16   :  { %109 = vmatpush1.bf16.msra.mxu1 %v83_v9  ;;  %777 = vmatpush3.bf16.msra.mxu0 %v873_v15  ;;  %v877_v19 = vld [vmem:[#allocation3 + $0xf8] sm:$0xff]   ;;  %v878_v20 = vld [vmem:[#allocation3 + $0x28] sm:$0xff]   ;;  %v882_v24 = vld [vmem:[#allocation3 + $0x20] sm:$0xff]  }
  0x17   :  { %151 = vmatprep.subr.bf16.mxu1 %v92_v13  ;;  %778 = vmatprep.subr.bf16.mxu0 %v874_v16  ;;  %v879_v21 = vld [vmem:[#allocation3 + $0xb8] sm:$0xff]   ;;  %v883_v25 = vld [vmem:[#allocation3 + $0xb0] sm:$0xff]   ;;  %v885_v27 = vld [vmem:[#allocation3 + $0xe8] sm:$0xff]  }
  0x18   :  { %v884_v26 = vld [vmem:[#allocation3 + $0x58] sm:$0xff]   ;;  %v887_v29 = vld [vmem:[#allocation3 + $0xa8] sm:$0xff]   ;;  %v888_v30 = vld [vmem:[#allocation3 + $0x50] sm:$0xff]  }
  0x19   :  { %731 = vmatmul.mubr.msk.bf16.vlgmr.msra.gmra.mxu1 %vm74_vm2, %v868_v8  ;;  %v886_v28 = vld [vmem:[#allocation3 + $0x18] sm:$0xff]   ;;  %v889_v31 = vld [vmem:[#allocation3 + $0xe0] sm:$0xff]   ;;  %v890_v32 = vld [vmem:[#allocation3 + $0x10] sm:$0xff]  }
  0x1a   :  { %152 = vmatpush1.bf16.msra.mxu1 %v89_v14  ;;  %169 = vmatprep.mubr.bf16.mxu1 %v941_v1  ;;  %v891_v33 = vld [vmem:[#allocation3 + $0xa0] sm:$0xff]   ;;  %v892_v34 = vld [vmem:[#allocation3 + $0x48] sm:$0xff]   ;;  %v893_v35 = vld [vmem:[#allocation3 + $0xd8] sm:$0xff]  }
  0x1b   :  { %779 = vmatpush3.bf16.msra.mxu0 %v875_v17  ;;  %798 = vmatprep.subr.bf16.mxu1 %v877_v19  ;;  %v894_v36 = vld [vmem:[#allocation3 + $0x8] sm:$0xff]   ;;  %v895_v37 = vld [vmem:[#allocation3 + $0x98] sm:$0xff]   ;;  %v896_v38 = vld [vmem:[#allocation3 + $0x40] sm:$0xff]  }
  0x1c   :  { %780 = vmatprep.subr.bf16.mxu0 %v876_v18  ;;  %v897_v39 = vld [vmem:[#allocation3 + $0xd0] sm:$0xff]   ;;  %v898_v40 = vld [vmem:[#allocation3] sm:$0xff]   ;;  %v900_v42 = vld [vmem:[#allocation3 + $0xc8] sm:$0xff]  }
  0x1d   :  { %v899_v41 = vld [vmem:[#allocation3 + $0x90] sm:$0xff]   ;;  %v901_v43 = vld [vmem:[#allocation3 + $0x88] sm:$0xff]   ;;  %v902_v44 = vld [vmem:[#allocation3 + $0xc0] sm:$0xff]  }
  0x1e   :  { %v903_v45 = vld [vmem:[#allocation3 + $0x80] sm:$0xff]   ;;  %v904_v58 = vld [vmem:[%s1053_s4 + $0x38] sm:$0xff]   ;;  %v733_v19 = vld [vmem:[%s1052_s3] ss:$0 sm:$0xff] }
  0x1f   :  { %781 = vmatpush3.bf16.msra.mxu0 %v878_v20  ;;  %v906_v5 = vld [vmem:[%s1053_s4 + $0x28] sm:$0xff]   ;;  %v907_v6 = vld [vmem:[%s1053_s4 + $0x20] sm:$0xff]   ;;  %v908_v7 = vld [vmem:[%s1053_s4 + $0x18] sm:$0xff]  }
  0x20   :  { %782 = vmatprep.subr.bf16.mxu0 %v880_v22  ;;  %v910_v9 = vld [vmem:[%s1053_s4 + $0x8] sm:$0xff]   ;;  %v911_v10 = vld [vmem:[%s1053_s4] sm:$0xff]  }
  0x21   :  { %732 = vmatmul.mubr.msk.bf16.vlgmr.msra.gmra.mxu1 %vm74_vm2, %v868_v8  ;;  %v909_v8 = vld [vmem:[%s1053_s4 + $0x10] sm:$0xff]  }
  0x22   :  { %799 = vmatpush3.bf16.msra.mxu1 %v879_v21 }
  0x23   :  { %800 = vmatprep.subr.bf16.mxu1 %v881_v23  ;;  %783 = vmatpush3.bf16.msra.mxu0 %v882_v24 }
  0x24   :  { %784 = vmatprep.subr.bf16.mxu0 %v884_v26 }
  0x26   :  { %801 = vmatpush3.bf16.msra.mxu1 %v883_v25 }
  0x27   :  { %802 = vmatprep.subr.bf16.mxu1 %v885_v27  ;;  %785 = vmatpush3.bf16.msra.mxu0 %v886_v28 }
  0x28   :  { %786 = vmatprep.subr.bf16.mxu0 %v888_v30 }
  0x2a   :  { %803 = vmatpush3.bf16.msra.mxu1 %v887_v29 }
  0x2b   :  { %804 = vmatprep.subr.bf16.mxu1 %v889_v31  ;;  %787 = vmatpush3.bf16.msra.mxu0 %v890_v32  ;;  %v703_v31 = vld [vmem:[#allocation2] sm:$0x1] }
  0x2c   :  { %788 = vmatprep.subr.bf16.mxu0 %v892_v34  ;;  %706 = vperm.xlu0 %864, %v703_v31  }
  0x2e   :  { %805 = vmatpush3.bf16.msra.mxu1 %v891_v33  ;;  %v766_v33 = vld [vmem:[%s1054_s5] ss:$0 sm:$0xff] }
  0x2f   :  { %806 = vmatprep.subr.bf16.mxu1 %v893_v35  ;;  %789 = vmatpush3.bf16.msra.mxu0 %v894_v36 }
  0x30   :  { %790 = vmatprep.subr.bf16.mxu0 %v896_v38 }
  0x32   :  { %807 = vmatpush3.bf16.msra.mxu1 %v895_v37 }
  0x33   :  { %808 = vmatprep.subr.bf16.mxu1 %v897_v39  ;;  %791 = vmatpush3.bf16.msra.mxu0 %v898_v40 }
  0x34   :  { %831 = vmatprep.subr.bf16.mxu0 %v943_v46 }
  0x36   :  { %809 = vmatpush3.bf16.msra.mxu1 %v899_v41 }
  0x37   :  { %810 = vmatprep.subr.bf16.mxu1 %v900_v42 }
  0x3a   :  { %811 = vmatpush3.bf16.msra.mxu1 %v901_v43  ;;  %v655_v43 = vld [vmem:[%s1055_s6] sm:$0xf] }
  0x3b   :  { %812 = vmatprep.subr.bf16.mxu1 %v902_v44  ;;  %v709_v44 = vlaneseq }
  0x3e   :  { %813 = vmatpush3.bf16.msra.mxu1 %v903_v45  ;;  %v710_v45 = vshrl.u32 %v709_v44, 7 }
  0x3f   :  { %851 = vmatprep.subr.bf16.mxu1 %v943_v46 }
  0xd9   :  { %v128_v47 = vpop.f32.mrf.mxu1 }
  0xdb   :  { %v130_v48 = vpop.f32.mrf.mxu1 }
  0xdd   :  { %v132_v49 = vpop.f32.mrf.mxu1 }
  0xde   :  { %v180_v50 = vpack.c.bf16 %v132_v49, %v128_v47  ;;  %v707_v47 = vpop.permute.xlu0 %706 }
  0xdf   :  { %v134_v51 = vpop.f32.mrf.mxu1 }
  0xe0   :  { %v181_v52 = vpack.c.bf16 %v134_v51, %v130_v48  ;;  %v184_v53 = vmul.bf16 1009007652, %v180_v50 }
  0xe1   :  { %v171_v54 = vpop.f32.mrf.mxu1 }
  0xe2   :  { %v185_v55 = vmul.bf16 1009007652, %v181_v52  ;;  %v188_v59 = vmax.bf16 %v184_v53, %v180_v50 }
  0xe3   :  { %v173_v56 = vpop.f32.mrf.mxu1 }
  0xe4   :  { %v189_v57 = vmax.bf16 %v185_v55, %v181_v52 }
  0xe5   :  { %v175_v60 = vpop.f32.mrf.mxu1 }
  0xe6   :  { %v182_v61 = vpack.c.bf16 %v175_v60, %v171_v54  ;;  %487 = vmatprep.mubr.bf16.mxu0 %v189_v57 }
  0xe7   :  { %v177_v62 = vpop.f32.mrf.mxu1  ;;  %488 = vmatmul.mubr.bf16.vlgmr.msra.gmra.mxu0 %v188_v59 }
  0xe8   :  { %v183_v63 = vpack.c.bf16 %v177_v62, %v173_v56  ;;  %832 = vmatpush3.bf16.msra.mxu0 %v904_v58  ;;  %v186_v1 = vmul.bf16 1009007652, %v182_v61  ;;  %847 = vmatprep.mubr.msk.bf16.mxu0 %vm944_vm3, %v943_v46 }
  0xe9   :  { %833 = vmatprep.subr.bf16.mxu0 %v943_v46 }
  0xea   :  { %v187_v2 = vmul.bf16 1009007652, %v183_v63  ;;  %v190_v4 = vmax.bf16 %v186_v1, %v182_v61 }
  0xec   :  { %v191_v3 = vmax.bf16 %v187_v2, %v183_v63  ;;  %834 = vmatpush3.bf16.msra.mxu0 %v905_v0 }
  0xed   :  { %835 = vmatprep.subr.bf16.mxu0 %v943_v46 }
  0xee   :  { %528 = vmatprep.mubr.bf16.mxu1 %v191_v3 }
  0xef   :  { %529 = vmatmul.mubr.bf16.vlgmr.msra.gmra.mxu1 %v190_v4 }
  0xf0   :  { %836 = vmatpush3.bf16.msra.mxu0 %v906_v5  ;;  %853 = vmatprep.mubr.msk.bf16.mxu1 %vm944_vm3, %v943_v46 }
  0xf1   :  { %837 = vmatprep.subr.bf16.mxu0 %v943_v46 }
  0xf4   :  { %838 = vmatpush3.bf16.msra.mxu0 %v907_v6 }
  0xf5   :  { %839 = vmatprep.subr.bf16.mxu0 %v943_v46 }
  0xf8   :  { %840 = vmatpush3.bf16.msra.mxu0 %v908_v7 }
  0xf9   :  { %841 = vmatprep.subr.bf16.mxu0 %v943_v46 }
  0xfc   :  { %842 = vmatpush3.bf16.msra.mxu0 %v909_v8 }
  0xfd   :  { %843 = vmatprep.subr.bf16.mxu0 %v943_v46 }
 0x100   :  { %844 = vmatpush3.bf16.msra.mxu0 %v910_v9 }
 0x101   :  { %845 = vmatprep.subr.bf16.mxu0 %v943_v46  ;;  %v711_v46 = vsub.s32 0, %v710_v45 }
 0x103   :  { %v712_v48 = vrot.slane %v707_v47, %v711_v46 }
 0x104   :  { %846 = vmatpush3.bf16.msra.mxu0 %v911_v10 }
 0x1a7   :  { %v792_v11 = vpop.f32.mrf.mxu0 }
 0x1a9   :  { %v793_v12 = vpop.f32.mrf.mxu0 }
 0x1aa   :  { %v794_v17 = vadd.f32 %v793_v12, %v792_v11 }
 0x1ab   :  { %v795_v13 = vpop.f32.mrf.mxu0 }
 0x1ac   :  { %v490_v23 = vadd.f32 %v794_v17, %v733_v19 }
 0x1ad   :  { %v796_v14 = vpop.f32.mrf.mxu0 }
 0x1ae   :  { %v797_v18 = vadd.f32 %v796_v14, %v795_v13 }
 0x1af   :  { %v814_v15 = vpop.f32.mrf.mxu1 }
 0x1b0   :  { %v493_v24 = vadd.f32 %v797_v18, %v733_v19 }
 0x1b1   :  { %v815_v16 = vpop.f32.mrf.mxu1 }
 0x1b2   :  { %v816_v21 = vadd.f32 %v815_v16, %v814_v15 }
 0x1b3   :  { %v817_v20 = vpop.f32.mrf.mxu1 }
 0x1b4   :  { %v531_v26 = vadd.f32 %v816_v21, %v490_v23 }
 0x1b5   :  { %v818_v22 = vpop.f32.mrf.mxu1 }
 0x1b6   :  { %v819_v25 = vadd.f32 %v818_v22, %v817_v20 }
 0x1b8   :  { %v534_v27 = vadd.f32 %v819_v25, %v493_v24 }
 0x1ba   :  { %v537_v28 = vpack.c.bf16 %v534_v27, %v531_v26 }
 0x1bc   :  { %v538_v29 = vmul.bf16 1009007652, %v537_v28 }
 0x1be   :  { %v539_v30 = vmax.bf16 %v538_v29, %v537_v28 }
 0x1c0   :  { %848 = vmatmul.mubr.bf16.vlgmr.msra.gmra.mxu0 %v539_v30 }
 0x280   :  { %v645_v32 = vpop.f32.mrf.mxu0 }
 0x281   :  { %v646_v36 = vadd.f32 %v766_v33, %v645_v32 }
 0x282   :  { %v849_v34 = vpop.f32.mrf.mxu0 }
 0x284   :  { %v648_v35 = vpop.f32.mrf.mxu0 }
 0x285   :  { %v649_v37 = vadd.f32 %v766_v33, %v648_v35 }
 0x286   :  { %v850_v38 = vpop.f32.mrf.mxu0 }
 0x287   :  { %v652_v39 = vpack.c.bf16 %v649_v37, %v646_v36 }
 0x289   :  { %v653_v40 = vmul.bf16 1009007652, %v652_v39 }
 0x28b   :  { %v654_v41 = vmax.bf16 %v653_v40, %v652_v39 }
 0x28d   :  { %v661_v42 = vsel %vm656_vm4, %v654_v41, 0 }
 0x28e   :  { %852 = vmatpush3.bf16.xpose.msra.mxu1 %v661_v42 }
 0x295   :  { %854 = vmatmul.mubr.msk.bf16.vlgmr.msra.gmra.mxu1 %vm656_vm4, %v655_v43 }
 0x355   :  { %v697_v49 = vpop.f32.mrf.mxu1 }
 0x356   :  { %v713_v50 = vadd.f32 %v712_v48, %v697_v49 }
 0x357   :  { %v855_v51 = vpop.f32.mrf.mxu1 }
 0x358   :  { %v714_v52 = vsub.f32 0.0, %v713_v50 }
 0x359   :  { %v700_v53 = vpop.f32.mrf.mxu1 }
 0x35a   :  { %v715_v54 = vmul.f32 1.442695, %v714_v52 }
 0x35b   :  { %v856_v55 = vpop.f32.mrf.mxu1 }
 0x35c   :  { %912 = vpow2.f32 %v715_v54 }
 0x369   :  { %v913_v56 = vpop.eup %912 }
 0x36a   :  { %v717_v57 = vadd.f32 1.0, %v913_v56 }
 0x36c   :  { %914 = vrcp.f32 %v717_v57 }
 0x379   :  { %v915_v58 = vpop.eup %914 }
 0x37a   :  { %720 = vst.msk [vmem:[%s1057_s8] sm:$0x1] %vm719_vm5, %v915_v58 }
 0x37b   :  { %725 = vsyncpa [#allocation4], 1 }

</bundles_post_ra>
